<compile_context>
chip_gen: v6e
topology: v6e:2x2x1
jax: 0.10.0
libtpu: 0.0.40
codegen_flags: <defaults>
</compile_context>

<pallas_src>
import jax
import jax.numpy as jnp
from jax.experimental import pallas as pl
from jax.experimental.pallas import tpu as pltpu


_VMEM_STREAM_BUDGET = 24 * 1024 * 1024   # bytes for double-buffered obs + out blocks
_MAX_BATCH_TILE = 65536                  # hard cap on rows per grid step
_SCOPED_VMEM_LIMIT = 32 * 1024 * 1024    # raise v5e's 16 MiB default; matches v6e/v7x


def _encoder_kernel(x_ref, w_ref, o_ref):
    # x_ref : [TB, obs_dim]        obs batch tile (f32 or bf16)
    # w_ref : [state_dim, obs_dim] weight already scaled by 1/tau (obs dtype)
    # o_ref : [state_dim, TB]      f32 lane-dense (transposed) output
    x = x_ref[...]
    w = w_ref[...]

    # logits^T = (W/tau) @ x^T -> [state_dim, TB]; contraction over obs_dim via
    # dot_general (no explicit transpose in the kernel body), f32 accumulation.
    # TODO(synk): per review, verify with pl.lower_as_mlir that Mosaic does not
    # materialize a VMEM transpose of the large obs tile for this orientation.
    logits = jax.lax.dot_general(
        w, x,
        dimension_numbers=(((1,), (1,)), ((), ())),
        preferred_element_type=jnp.float32,
    )

    # Numerically stable softmax over state_dim (sublane axis).  Exact division:
    # kernel is memory-bound, so this costs nothing and rows sum to 1 exactly
    # (up to f32 rounding).
    m = jnp.max(logits, axis=0, keepdims=True)
    e = jnp.exp(logits - m)
    denom = jnp.sum(e, axis=0, keepdims=True)
    o_ref[...] = e / denom


def _choose_batch_tile(B, obs_dim, state_dim, obs_itemsize):
    """Derive rows-per-grid-step from a VMEM budget.

    Streamed VMEM per step = 2*tb*obs_dim*itemsize (double-buffered obs)
                           + 2*state_dim*tb*4      (double-buffered f32 output).
    Target ~24 MiB of streamed blocks: safely inside v7x's 64 MiB physical VMEM
    (32 MiB default scope) and the 32 MiB scoped limit we request explicitly
    (needed on v5e).  tb is kept a multiple of 128 so the [state_dim, tb] output
    block is lane-aligned and the obs block is sublane-aligned for f32 (8) and
    bf16 (16) streams alike.
    """
    per_row = 2 * obs_dim * obs_itemsize + 2 * state_dim * 4
    tb = min(_VMEM_STREAM_BUDGET // per_row, _MAX_BATCH_TILE)
    tb = max(128, (tb // 128) * 128)
    if B <= tb:
        return B  # one block == full array (always satisfies the tiling rules)
    # Keep >= ~4 grid steps so the "parallel" batch axis can be sharded across
    # TensorCores (v7x megacore) and the pipeline stays busy.
    quarter = (((B + 3) // 4) + 127) // 128 * 128
    return max(128, min(tb, quarter))


def encoder_forward(obs, weight, tau=1.0, *, transposed_output=False):
    """obs: [B, obs_dim] (f32 or bf16); weight: [state_dim, obs_dim] (PyTorch
    Linear layout).  Returns softmax((obs @ weight.T) / tau, axis=-1).

    transposed_output=False (default) -> [B, state_dim] (module-faithful; the
    small transpose happens in the wrapper).  transposed_output=True returns the
    kernel-native lane-dense [state_dim, B] layout with no extra HBM pass.
    NOTE: tau is a static Python hyperparameter (concretized at trace time).
    """
    obs = jnp.asarray(obs)
    if obs.dtype not in (jnp.float32, jnp.bfloat16):
        obs = obs.astype(jnp.float32)
    # Fold 1/tau into the tiny weight once; cast it to the obs stream dtype so
    # the MXU sees a homogeneous (bf16 x bf16 or f32 x f32) matmul.
    w_scaled = (jnp.asarray(weight, jnp.float32) *
                jnp.float32(1.0 / float(tau))).astype(obs.dtype)

    B, obs_dim = obs.shape
    state_dim = w_scaled.shape[0]

    tb = _choose_batch_tile(B, obs_dim, state_dim, obs.dtype.itemsize)
    grid = (pl.cdiv(B, tb),)

    out_t = pl.pallas_call(
        _encoder_kernel,
        out_shape=jax.ShapeDtypeStruct((state_dim, B), jnp.float32),
        grid_spec=pltpu.PrefetchScalarGridSpec(
            num_scalar_prefetch=0,
            grid=grid,
            in_specs=[
                pl.BlockSpec((tb, obs_dim), lambda i: (i, 0)),          # obs stream
                pl.BlockSpec((state_dim, obs_dim), lambda i: (0, 0)),   # resident weight
            ],
            out_specs=pl.BlockSpec((state_dim, tb), lambda i: (0, i)),  # lane-dense
        ),
        compiler_params=pltpu.CompilerParams(
            dimension_semantics=("parallel",),       # independent batch tiles
            vmem_limit_bytes=_SCOPED_VMEM_LIMIT,     # v5e default is only 16 MiB
        ),
    )(obs, w_scaled)

    if transposed_output:
        return out_t          # [state_dim, B]
    return out_t.T            # [B, state_dim] (module-faithful layout)


def make_orthogonal_weight(key, state_dim, obs_dim):
    """Orthogonal init matching nn.init.orthogonal_ semantics: rows of the
    [state_dim, obs_dim] weight are orthonormal (state_dim <= obs_dim)."""
    a = jax.random.normal(key, (obs_dim, state_dim), dtype=jnp.float32)
    q, r = jnp.linalg.qr(a)                      # q: [obs_dim, state_dim]
    d = jnp.sign(jnp.diagonal(r))
    q = q * d[None, :]
    return q.T                                   # [state_dim, obs_dim]


# TODO(synk): the 'gumble' (gumbel-softmax) branch of Encoder.forward is not
# implemented; only the default 'vanilla' softmax path is reproduced.


if __name__ == "__main__":
    key = jax.random.PRNGKey(0)
    k_obs, k_w = jax.random.split(key)

    B = 8
    obs_dim = 32
    state_dim = 3
    tau = 1.0

    obs = jax.random.normal(k_obs, (B, obs_dim), dtype=jnp.float32)
    weight = make_orthogonal_weight(k_w, state_dim, obs_dim)   # [state_dim, obs_dim]

    out = jax.block_until_ready(encoder_forward(obs, weight, tau=tau))

    # reference (pure JAX)
    ref = jax.nn.softmax((obs @ weight.T) / tau, axis=-1)
    assert out.shape == (B, state_dim)
    # tolerance covers possible bf16-pass MXU behavior for f32 matmuls on HW
    assert jnp.allclose(out, ref, atol=2e-3, rtol=2e-3)
    # exact division -> rows sum to 1 up to f32 rounding
    assert jnp.allclose(jnp.sum(out, axis=-1), 1.0, atol=1e-4)

    # bf16 obs stream (halves the dominant HBM read); reference uses the same
    # bf16-rounded operands with f32 accumulation (apples-to-apples).
    obs_bf = obs.astype(jnp.bfloat16)
    out_bf = jax.block_until_ready(encoder_forward(obs_bf, weight, tau=tau))
    w_bf = weight.astype(jnp.bfloat16).astype(jnp.float32)
    ref_bf = jax.nn.softmax((obs_bf.astype(jnp.float32) @ w_bf.T) / tau, axis=-1)
    assert out_bf.shape == (B, state_dim)
    assert jnp.allclose(out_bf, ref_bf, atol=1e-3, rtol=1e-3)

    # transposed (kernel-native, no extra HBM pass) layout check
    out_t = jax.block_until_ready(
        encoder_forward(obs, weight, tau=tau, transposed_output=True))
    assert out_t.shape == (state_dim, B)
    assert jnp.allclose(out_t.T, ref, atol=2e-3, rtol=2e-3)

    print("KERNEL_OK")
</pallas_src>

<mosaic_0001>
module attributes {stable_mosaic.version = 11 : i64} {
  func.func @_encoder_kernel(%arg0: i32, %arg1: memref<8x32xf32, #tpu.memory_space<vmem>>, %arg2: memref<3x32xf32, #tpu.memory_space<vmem>>, %arg3: memref<3x8xf32, #tpu.memory_space<vmem>>) attributes {dimension_semantics = [#tpu.dimension_semantics<parallel>], iteration_bounds = array<i64: 1>, scalar_prefetch = 0 : i64, scratch_operands = 0 : i64, tpu.core_type = #tpu.core_type<tc>, window_params = [{transform_indices = @transform_0, window_bounds = array<i64: 8, 32>}, {pipeline_mode = #tpu.pipeline_mode<synchronous>, transform_indices = @transform_1, window_bounds = array<i64: 3, 32>}, {transform_indices = @transform_2, window_bounds = array<i64: 3, 8>}]} {
    %c0 = arith.constant 0 : index
    %c0_0 = arith.constant 0 : index
    %0 = vector.load %arg1[%c0, %c0_0] : memref<8x32xf32, #tpu.memory_space<vmem>>, vector<8x32xf32>
    %c0_1 = arith.constant 0 : index
    %c0_2 = arith.constant 0 : index
    %1 = vector.load %arg2[%c0_1, %c0_2] : memref<3x32xf32, #tpu.memory_space<vmem>>, vector<3x32xf32>
    %cst = arith.constant dense<0.000000e+00> : vector<3x8xf32>
    %2 = tpu.matmul %1, %0, %cst {dimension_numbers = #tpu.dot_dimension_numbers<[1], [1], [0], [0], [0, 0, 1, 0], [], []>} : vector<3x32xf32>, vector<8x32xf32>, vector<3x8xf32> -> vector<3x8xf32>
    %cst_3 = arith.constant dense<0xFF800000> : vector<8xf32>
    %3 = vector.multi_reduction <maximumf>, %2, %cst_3 [0] : vector<3x8xf32> to vector<8xf32>
    %4 = vector.shape_cast %3 : vector<8xf32> to vector<1x8xf32>
    %5 = vector.broadcast %4 : vector<1x8xf32> to vector<3x8xf32>
    %6 = arith.subf %2, %5 : vector<3x8xf32>
    %7 = math.exp %6 : vector<3x8xf32>
    %cst_4 = arith.constant dense<0.000000e+00> : vector<8xf32>
    %8 = vector.multi_reduction <add>, %7, %cst_4 [0] : vector<3x8xf32> to vector<8xf32>
    %9 = vector.shape_cast %8 : vector<8xf32> to vector<1x8xf32>
    %10 = vector.broadcast %9 : vector<1x8xf32> to vector<3x8xf32>
    %11 = arith.divf %7, %10 : vector<3x8xf32>
    %c0_5 = arith.constant 0 : index
    %c0_6 = arith.constant 0 : index
    %12 = vector.load %arg3[%c0_5, %c0_6] : memref<3x8xf32, #tpu.memory_space<vmem>>, vector<3x8xf32>
    tpu.vector_store %arg3[%c0_5, %c0_6], %11 {strides = array<i32>} : memref<3x8xf32, #tpu.memory_space<vmem>>, vector<3x8xf32>,
    return
  }
  func.func @transform_0(%arg0: i32) -> (i32, i32) {
    %c0_i32 = arith.constant 0 : i32
    %c0_i32_0 = arith.constant 0 : i32
    return %arg0, %c0_i32 : i32, i32
  }
  func.func @transform_1(%arg0: i32) -> (i32, i32) {
    %c0_i32 = arith.constant 0 : i32
    %c0_i32_0 = arith.constant 0 : i32
    %c0_i32_1 = arith.constant 0 : i32
    return %c0_i32, %c0_i32_0 : i32, i32
  }
  func.func @transform_2(%arg0: i32) -> (i32, i32) {
    %c0_i32 = arith.constant 0 : i32
    %c0_i32_0 = arith.constant 0 : i32
    return %c0_i32, %arg0 : i32, i32
  }
}

</mosaic_0001>

<bundles_post_ra>
// kernel: tpu_custom_call.1
= control target key start
LH: loop header
LB: loop body
LE: loop exit
PB: predicated region body
PF: predicated region fallthrough
CT: control target
= control target key end

     0   :  { %7 = vsyncpa [#allocation3], 0  ;;  %s268_s0 = inlined_call_operand.hbm [shape: f32[8,32], index: 0, kind: input, shape index: {}]   ;;  %s269_s1 = inlined_call_operand.hbm [shape: f32[3,32], index: 1, kind: input, shape index: {}]   ;;  %s270_s2 = inlined_call_operand.hbm [shape: f32[3,8], index: 2, kind: output, shape index: {}]  }
   0x1   :  { %8 = vsyncpa [#allocation6], 0 }
   0x2   :  { %9 = vsyncpa [#allocation4], 0  ;;  %s236_s9 = smov [#allocation2]   ;;  %s237_s11 = smov [#allocation5]  }
   0x3   :  { %s16_s10 = sshll.u32 %s236_s9, 4  ;;  %s26_s12 = sshll.u32 %s237_s11, 4  ;;  %s17_s10 = int_to_ptr.vmem [resolvable:$true] %s16_s10  ;;  %s27_s12 = int_to_ptr.vmem [resolvable:$true] %s26_s12 }
   0x4   :  { %s178_s13 = scalar_lea.vmem %s17_s10, 128  ;;  %p183_p1 = scmp.lt.s32.totalorder %s17_s10, %s17_s10 }
   0x5   :  { %p179_p0 = scmp.ne.s32.totalorder %s17_s10, %s178_s13  ;;  %p184_p2 = scmp.lt.s32.totalorder %s178_s13, %s178_s13 }
   0x7   :  { %p185_p3 = por %p184_p2, %p183_p1 }
   0x9   :  { %p186_p4 = pnand %p185_p3, %p179_p0 }
   0xb   :  { %189 = shalt.err (!%p186_p4)
}
   0xc   :  { %19 = dma.hbm_to_vmem [thread:$0]  %s268_s0, 128, %s17_s10, [#allocation3]  }
   0xd   :  { %s198_s16 = scalar_lea.vmem %s27_s12, 64  ;;  %p203_p6 = scmp.lt.s32.totalorder %s27_s12, %s27_s12 }
   0xe   :  { %p199_p5 = scmp.ne.s32.totalorder %s27_s12, %s198_s16  ;;  %p204_p7 = scmp.lt.s32.totalorder %s198_s16, %s198_s16 }
  0x10   :  { %p205_p8 = por %p204_p7, %p203_p6 }
  0x12   :  { %p206_p9 = pnand %p205_p8, %p199_p5 }
  0x14   :  { %209 = shalt.err (!%p206_p9)
}
  0x15   :  { %29 = dma.hbm_to_vmem [thread:$0]  %s269_s1, 64, %s27_s12, [#allocation6]  }
  0x16   :  { %230 = dma.done.wait [#allocation3], 128  }
  0x17   :  { %231 = vsyncadd [#allocation3], 4294967168 }
  0x18   :  { %232 = dma.done.wait [#allocation6], 64  }
  0x19   :  { %233 = vsyncadd [#allocation6], 4294967232  ;;  %v238_v0 = vmov 0.0   ;;  %vm239_vm0 = vmmov 0   ;;  %vm38_vm1 = vcmask 261120   ;;  %v36_v1 = vld [vmem:[#allocation2] sm:$0xff] }
  0x1a   :  { %156 = vmatprep.subr.mxu0 %v238_v0  ;;  %158 = vmatprep.mubr.msk.f32.mxu0 %vm239_vm0, %v238_v0  ;;  %v37_v2 = vld [vmem:[#allocation5] sm:$0x7]  ;;  %vm115_vm2 = vcmask 59392   ;;  %s240_s0 = smov [#allocation7]  }
  0x1b   :  { %157 = vmatpush3.xpose.msk.msra.mxu0 %vm38_vm1, %v36_v1  ;;  %s142_s1 = sshll.u32 %s240_s0, 4  ;;  %s143_s1 = int_to_ptr.vmem [resolvable:$true] %s142_s1 }
  0x1c   :  { %s210_s19 = scalar_lea.vmem %s143_s1, 64  ;;  %p215_p11 = scmp.lt.s32.totalorder %s143_s1, %s143_s1 }
  0x1d   :  { %p211_p10 = scmp.ne.s32.totalorder %s143_s1, %s210_s19  ;;  %p216_p12 = scmp.lt.s32.totalorder %s210_s19, %s210_s19 }
  0x1e   :  { %159 = vmatmul.mubr.msk.f32.vlgmr.msra.gmra.mxu0 %vm38_vm1, %v37_v2 }
  0x1f   :  { %p217_p13 = por %p216_p12, %p215_p11 }
  0x21   :  { %p218_p0 = pnand %p217_p13, %p211_p10 }
  0xde   :  { %v111_v3 = vpop.f32.mrf.mxu0 }
  0xdf   :  { %v116_v4 = vsel %vm115_vm2, %v111_v3, -inf }
  0xe0   :  { %v117_v5 = vrot.slane %v116_v4, 4  ;;  %v160_v6 = vpop.f32.mrf.mxu0 }
  0xe2   :  { %v118_v7 = vmax.f32 %v116_v4, %v117_v5 }
  0xe4   :  { %v119_v8 = vrot.slane %v118_v7, 2 }
  0xe6   :  { %v120_v9 = vmax.f32 %v118_v7, %v119_v8 }
  0xe8   :  { %v121_v10 = vrot.slane %v120_v9, 1 }
  0xea   :  { %v122_v11 = vmax.f32 %v120_v9, %v121_v10 }
  0xec   :  { %v123_v12 = vsub.f32 %v111_v3, %v122_v11 }
  0xee   :  { %v124_v13 = vmul.f32 1.442695, %v123_v12 }
  0xf0   :  { %166 = vpow2.f32 %v124_v13 }
  0xfd   :  { %v167_v14 = vpop.eup %166 }
  0xfe   :  { %v126_v15 = vsel %vm115_vm2, %v167_v14, 0.0 }
  0xff   :  { %v127_v16 = vrot.slane %v126_v15, 4 }
 0x101   :  { %v128_v17 = vadd.f32 %v127_v16, %v126_v15 }
 0x103   :  { %v129_v18 = vrot.slane %v128_v17, 2 }
 0x105   :  { %v130_v19 = vadd.f32 %v129_v18, %v128_v17 }
 0x107   :  { %v131_v20 = vrot.slane %v130_v19, 1 }
 0x109   :  { %v132_v21 = vadd.f32 %v131_v20, %v130_v19 }
 0x10b   :  { %168 = vrcp.f32 %v132_v21 }
 0x118   :  { %v169_v22 = vpop.eup %168 }
 0x119   :  { %v134_v23 = vmul.f32 %v169_v22, %v167_v14 }
 0x11b   :  { %135 = vst.msk [vmem:[#allocation7] sm:$0x7] %vm115_vm2, %v134_v23 }
 0x11c   :  { %221 = shalt.err (!%p218_p0)
}
 0x11d   :  { %145 = dma.vmem_to_hbm [thread:$0]  %s143_s1, 64, %s270_s2, [#allocation4]  }
 0x11e   :  { %234 = dma.done.wait [#allocation4], 64  }
 0x11f   :  { %235 = vsyncadd [#allocation4], 4294967232 }
 0x120   :  { %149 = vsyncpa [#allocation3], 1 }
 0x121   :  { %150 = vsyncpa [#allocation6], 1 }
 0x122   :  { %151 = vsyncpa [#allocation4], 1 }

</bundles_post_ra>
